<compile_context>
chip_gen: v5e
topology: v5e:2x2
jax: 0.10.0
libtpu: 0.0.40
codegen_flags: <defaults>
</compile_context>

<pallas_src>
import jax
import jax.numpy as jnp
from jax import lax
from jax.experimental import pallas as pl
from jax.experimental.pallas import tpu as pltpu

# ---- small, ViT-consistent synthetic config ---------------------------------
B, S, H = 2, 8, 32          # batch, seq_len, hidden_size
NH, HD = 4, 8               # head_num, head_dim  (NH * HD == H, num_kv_head == NH)
MLP_DIM = 64                # transformer.mlp_dim
EPS = 1e-6
SCALE = float(HD) ** -0.5
_INV_SQRT2 = 0.7071067811865476


def _layernorm_fused(x, g, b):
    # single-pass moments: E[x], E[x^2]; var = E[x^2] - mu^2
    mu = jnp.mean(x, axis=-1, keepdims=True)
    ex2 = jnp.mean(x * x, axis=-1, keepdims=True)
    var = ex2 - mu * mu
    return (x - mu) * lax.rsqrt(var + EPS) * g + b


def _layernorm_ref(x, g, b):
    mu = jnp.mean(x, axis=-1, keepdims=True)
    var = jnp.mean(jnp.square(x - mu), axis=-1, keepdims=True)
    return (x - mu) * lax.rsqrt(var + EPS) * g + b


def _gelu_exact(x):
    # F.gelu default (exact, erf-based)
    return 0.5 * x * (1.0 + lax.erf(x * _INV_SQRT2))


def encoder_block_kernel(x_ref, ln1g_ref, ln1b_ref,
                         wqkv_ref, bqkv_ref,
                         wo_ref, bo_ref,
                         ln2g_ref, ln2b_ref,
                         w1_ref, b1_ref, w2_ref, b2_ref,
                         out_ref, *opt_attw_ref):
    # x_ref/out_ref: (B*S, H);  optional attw_ref: (NH*B, S, S)  (head-major)
    x = x_ref[...]

    # --- attn_norm (fused-moment LayerNorm) ----------------------------------
    xn = _layernorm_fused(x, ln1g_ref[...], ln1b_ref[...])

    # --- fused Q/K/V projection: single MXU pass, N = 3H (scale folded in Q) --
    qkv = jnp.dot(xn, wqkv_ref[...], preferred_element_type=jnp.float32) + bqkv_ref[...]

    # --- head split: NH lane slices per tensor, then leading-axis-only
    #     stack + reshape (free re-indexing; no transposes, no per-(b,h) loop).
    #     Resulting batch index is x = h*B + b (head-major, batch-minor).
    def split_heads(col0):
        pieces = [qkv[:, col0 + h * HD: col0 + (h + 1) * HD] for h in range(NH)]
        st = jnp.stack(pieces, axis=0)            # (NH, B*S, HD)
        return st.reshape(NH * B, S, HD)          # (NH*B, S, HD)

    qh = split_heads(0)          # already scaled by 1/sqrt(HD)
    kh = split_heads(H)
    vh = split_heads(2 * H)

    # --- batched scaled-dot-product attention over all NH*B heads ------------
    s = jnp.einsum('xqd,xkd->xqk', qh, kh, preferred_element_type=jnp.float32)
    s = s - jnp.max(s, axis=-1, keepdims=True)
    e = jnp.exp(s)
    # exact reciprocal (approx=True would break the 2e-5 attw tolerance)
    inv_l = 1.0 / jnp.sum(e, axis=-1, keepdims=True)
    p = e * inv_l                                  # softmax, (NH*B, S, S)
    if opt_attw_ref:                               # optional vis output
        opt_attw_ref[0][...] = p

    ctx = jnp.einsum('xqk,xkd->xqd', p, vh, preferred_element_type=jnp.float32)

    # --- output projection: head-contracting, no Wo replication --------------
    # ctx (NH*B, S, HD) -> (NH, B*S, HD)  (leading split + sublane merge; free)
    ctx_r = ctx.reshape(NH, B * S, HD)
    wo3 = wo_ref[...].reshape(NH, HD, H)           # (NH, HD, H), a view of Wo rows
    proj_h = jnp.einsum('hrd,hdo->hro', ctx_r, wo3,
                        preferred_element_type=jnp.float32)     # (NH, B*S, H)
    # NH-1 VPU adds along the major axis (tiny); at ViT-B use one lane-dense
    # (B*S,H)@(H,H) Wo matmul instead of the split-Wo + sum trick.
    attn_out = jnp.sum(proj_h, axis=0) + bo_ref[...]            # (B*S, H)

    h1 = attn_out + x                                           # residual 1

    # --- mlp_norm + MLP (fc1 -> exact GELU -> fc2) + residual ----------------
    hn = _layernorm_fused(h1, ln2g_ref[...], ln2b_ref[...])
    f1 = _gelu_exact(jnp.dot(hn, w1_ref[...],
                             preferred_element_type=jnp.float32) + b1_ref[...])
    f2 = jnp.dot(f1, w2_ref[...], preferred_element_type=jnp.float32) + b2_ref[...]
    out_ref[...] = f2 + h1


def pack_params(raw):
    """One-time host-side transform: fold scale into Q, fuse QKV weights."""
    (ln1g, ln1b, wq, bq, wk, bk, wv, bv, wo, bo,
     ln2g, ln2b, w1, b1, w2, b2) = raw
    wqkv = jnp.concatenate([wq * SCALE, wk, wv], axis=1)    # (H, 3H)
    bqkv = jnp.concatenate([bq * SCALE, bk, bv], axis=1)    # (1, 3H)
    return (ln1g, ln1b, wqkv, bqkv, wo, bo, ln2g, ln2b, w1, b1, w2, b2)


def encoder_block(x, packed, *, vis=True):
    """x: (B, S, H) f32. Returns (output (B,S,H), attention weights (B,NH,S,S) or None)."""
    (ln1g, ln1b, wqkv, bqkv, wo, bo, ln2g, ln2b, w1, b1, w2, b2) = packed
    vmem = pl.BlockSpec(memory_space=pltpu.MemorySpace.VMEM)

    out_shapes = [jax.ShapeDtypeStruct((B * S, H), jnp.float32)]
    out_specs = [vmem]
    if vis:
        # TODO(synk): at real S store attw bf16 / lane-dense padded (masked softmax).
        out_shapes.append(jax.ShapeDtypeStruct((NH * B, S, S), jnp.float32))
        out_specs.append(vmem)

    fn = pl.pallas_call(
        encoder_block_kernel,
        out_shape=out_shapes,
        in_specs=[vmem] * 13,
        out_specs=out_specs,
        compiler_params=pltpu.CompilerParams(vmem_limit_bytes=64 * 1024 * 1024),
    )
    res = fn(x.reshape(B * S, H), ln1g, ln1b, wqkv, bqkv,
             wo, bo, ln2g, ln2b, w1, b1, w2, b2)

    out = res[0].reshape(B, S, H)
    if vis:
        # head-major (NH*B,S,S) slab -> (B,NH,S,S); wrapper-side layout plumbing.
        attw = res[1].reshape(NH, B, S, S).transpose(1, 0, 2, 3)
        return out, attw
    return out, None


# ---- pure-JAX reference (for a sanity check) --------------------------------
def encoder_block_ref(x, params):
    (ln1g, ln1b, wq, bq, wk, bk, wv, bv, wo, bo,
     ln2g, ln2b, w1, b1, w2, b2) = params
    xn = _layernorm_ref(x, ln1g, ln1b)
    q = xn @ wq + bq
    k = xn @ wk + bk
    v = xn @ wv + bv
    qh = q.reshape(B, S, NH, HD).transpose(0, 2, 1, 3)
    kh = k.reshape(B, S, NH, HD).transpose(0, 2, 1, 3)
    vh = v.reshape(B, S, NH, HD).transpose(0, 2, 1, 3)
    s = jnp.einsum("bhqd,bhkd->bhqk", qh, kh) * SCALE
    p = jax.nn.softmax(s, axis=-1)
    ctx = jnp.einsum("bhqk,bhkd->bhqd", p, vh).transpose(0, 2, 1, 3).reshape(B, S, H)
    h1 = ctx @ wo + bo + x
    hn = _layernorm_ref(h1, ln2g, ln2b)
    out = _gelu_exact(hn @ w1 + b1) @ w2 + b2 + h1
    return out, p


def make_params(key):
    ks = jax.random.split(key, 8)

    def xavier(k, shape):
        fan_in, fan_out = shape
        bound = (6.0 / (fan_in + fan_out)) ** 0.5
        return jax.random.uniform(k, shape, jnp.float32, -bound, bound)

    ln1g = jnp.ones((1, H), jnp.float32)
    ln1b = jnp.zeros((1, H), jnp.float32)
    ln2g = jnp.ones((1, H), jnp.float32)
    ln2b = jnp.zeros((1, H), jnp.float32)
    wq = xavier(ks[0], (H, H)); bq = jnp.zeros((1, H), jnp.float32) + 0.01
    wk = xavier(ks[1], (H, H)); bk = jnp.zeros((1, H), jnp.float32) - 0.01
    wv = xavier(ks[2], (H, H)); bv = jnp.zeros((1, H), jnp.float32) + 0.02
    wo = xavier(ks[3], (H, H)); bo = jnp.zeros((1, H), jnp.float32)
    w1 = xavier(ks[4], (H, MLP_DIM)); b1 = 1e-6 * jax.random.normal(ks[5], (1, MLP_DIM), jnp.float32)
    w2 = xavier(ks[6], (MLP_DIM, H)); b2 = 1e-6 * jax.random.normal(ks[7], (1, H), jnp.float32)
    return (ln1g, ln1b, wq, bq, wk, bk, wv, bv, wo, bo,
            ln2g, ln2b, w1, b1, w2, b2)


if __name__ == "__main__":
    key = jax.random.PRNGKey(0)
    kx, kp = jax.random.split(key)
    x = jax.random.normal(kx, (B, S, H), jnp.float32)
    raw_params = make_params(kp)

    out, attw = encoder_block(x, pack_params(raw_params), vis=True)
    out = jax.block_until_ready(out)
    attw = jax.block_until_ready(attw)

    out_ref, attw_ref = encoder_block_ref(x, raw_params)
    assert jnp.allclose(out, out_ref, atol=1e-4, rtol=1e-4), "output mismatch"
    assert jnp.allclose(attw, attw_ref, atol=2e-5, rtol=1e-4), "attention-weights mismatch"

    # exercise the vis=False fast path (no attention-weights writeback)
    out_novis, none_w = encoder_block(x, pack_params(raw_params), vis=False)
    out_novis = jax.block_until_ready(out_novis)
    assert none_w is None
    assert jnp.allclose(out_novis, out_ref, atol=1e-4, rtol=1e-4), "vis=False output mismatch"

    print("KERNEL_OK")
</pallas_src>

<mosaic_0001>
module attributes {stable_mosaic.version = 11 : i64} {
  func.func @encoder_block_kernel(%arg0: memref<16x32xf32, #tpu.memory_space<vmem>>, %arg1: memref<1x32xf32, #tpu.memory_space<vmem>>, %arg2: memref<1x32xf32, #tpu.memory_space<vmem>>, %arg3: memref<32x96xf32, #tpu.memory_space<vmem>>, %arg4: memref<1x96xf32, #tpu.memory_space<vmem>>, %arg5: memref<32x32xf32, #tpu.memory_space<vmem>>, %arg6: memref<1x32xf32, #tpu.memory_space<vmem>>, %arg7: memref<1x32xf32, #tpu.memory_space<vmem>>, %arg8: memref<1x32xf32, #tpu.memory_space<vmem>>, %arg9: memref<32x64xf32, #tpu.memory_space<vmem>>, %arg10: memref<1x64xf32, #tpu.memory_space<vmem>>, %arg11: memref<64x32xf32, #tpu.memory_space<vmem>>, %arg12: memref<1x32xf32, #tpu.memory_space<vmem>>, %arg13: memref<16x32xf32, #tpu.memory_space<vmem>>, %arg14: memref<8x8x8xf32, #tpu.memory_space<vmem>>) attributes {dimension_semantics = [], scalar_prefetch = 0 : i64, scratch_operands = 0 : i64, tpu.core_type = #tpu.core_type<tc>} {
    %c0 = arith.constant 0 : index
    %c0_0 = arith.constant 0 : index
    %0 = vector.load %arg0[%c0, %c0_0] : memref<16x32xf32, #tpu.memory_space<vmem>>, vector<16x32xf32>
    %c0_1 = arith.constant 0 : index
    %c0_2 = arith.constant 0 : index
    %1 = vector.load %arg1[%c0_1, %c0_2] : memref<1x32xf32, #tpu.memory_space<vmem>>, vector<1x32xf32>
    %c0_3 = arith.constant 0 : index
    %c0_4 = arith.constant 0 : index
    %2 = vector.load %arg2[%c0_3, %c0_4] : memref<1x32xf32, #tpu.memory_space<vmem>>, vector<1x32xf32>
    %cst = arith.constant dense<0.000000e+00> : vector<16xf32>
    %3 = vector.multi_reduction <add>, %0, %cst [1] : vector<16x32xf32> to vector<16xf32>
    %4 = vector.shape_cast %3 : vector<16xf32> to vector<16x1xf32>
    %cst_5 = arith.constant 3.200000e+01 : f32
    %5 = vector.broadcast %cst_5 : f32 to vector<16x1xf32>
    %6 = arith.divf %4, %5 : vector<16x1xf32>
    %7 = arith.mulf %0, %0 : vector<16x32xf32>
    %cst_6 = arith.constant dense<0.000000e+00> : vector<16xf32>
    %8 = vector.multi_reduction <add>, %7, %cst_6 [1] : vector<16x32xf32> to vector<16xf32>
    %9 = vector.shape_cast %8 : vector<16xf32> to vector<16x1xf32>
    %cst_7 = arith.constant 3.200000e+01 : f32
    %10 = vector.broadcast %cst_7 : f32 to vector<16x1xf32>
    %11 = arith.divf %9, %10 : vector<16x1xf32>
    %12 = arith.mulf %6, %6 : vector<16x1xf32>
    %13 = arith.subf %11, %12 : vector<16x1xf32>
    %14 = vector.broadcast %6 : vector<16x1xf32> to vector<16x32xf32>
    %15 = arith.subf %0, %14 : vector<16x32xf32>
    %cst_8 = arith.constant 9.99999997E-7 : f32
    %16 = vector.broadcast %cst_8 : f32 to vector<16x1xf32>
    %17 = arith.addf %13, %16 : vector<16x1xf32>
    %18 = math.rsqrt %17 : vector<16x1xf32>
    %19 = vector.broadcast %18 : vector<16x1xf32> to vector<16x32xf32>
    %20 = arith.mulf %15, %19 : vector<16x32xf32>
    %21 = vector.broadcast %1 : vector<1x32xf32> to vector<16x32xf32>
    %22 = arith.mulf %20, %21 : vector<16x32xf32>
    %23 = vector.broadcast %2 : vector<1x32xf32> to vector<16x32xf32>
    %24 = arith.addf %22, %23 : vector<16x32xf32>
    %c0_9 = arith.constant 0 : index
    %c0_10 = arith.constant 0 : index
    %25 = vector.load %arg3[%c0_9, %c0_10] : memref<32x96xf32, #tpu.memory_space<vmem>>, vector<32x96xf32>
    %cst_11 = arith.constant dense<0.000000e+00> : vector<16x96xf32>
    %26 = tpu.matmul %24, %25, %cst_11 {dimension_numbers = #tpu.dot_dimension_numbers<[1], [0], [0], [1], [0, 0, 1, 1], [], []>} : vector<16x32xf32>, vector<32x96xf32>, vector<16x96xf32> -> vector<16x96xf32>
    %c0_12 = arith.constant 0 : index
    %c0_13 = arith.constant 0 : index
    %27 = vector.load %arg4[%c0_12, %c0_13] : memref<1x96xf32, #tpu.memory_space<vmem>>, vector<1x96xf32>
    %28 = vector.broadcast %27 : vector<1x96xf32> to vector<16x96xf32>
    %29 = arith.addf %26, %28 : vector<16x96xf32>
    %30 = vector.extract_strided_slice %29 {offsets = [0, 0], sizes = [16, 8], strides = [1, 1]} : vector<16x96xf32> to vector<16x8xf32>
    %31 = vector.extract_strided_slice %29 {offsets = [0, 8], sizes = [16, 8], strides = [1, 1]} : vector<16x96xf32> to vector<16x8xf32>
    %32 = vector.extract_strided_slice %29 {offsets = [0, 16], sizes = [16, 8], strides = [1, 1]} : vector<16x96xf32> to vector<16x8xf32>
    %33 = vector.extract_strided_slice %29 {offsets = [0, 24], sizes = [16, 8], strides = [1, 1]} : vector<16x96xf32> to vector<16x8xf32>
    %34 = vector.shape_cast %30 : vector<16x8xf32> to vector<1x16x8xf32>
    %35 = vector.shape_cast %31 : vector<16x8xf32> to vector<1x16x8xf32>
    %36 = vector.shape_cast %32 : vector<16x8xf32> to vector<1x16x8xf32>
    %37 = vector.shape_cast %33 : vector<16x8xf32> to vector<1x16x8xf32>
    %38 = tpu.concatenate %34, %35, %36, %37 in 0 : vector<1x16x8xf32>, vector<1x16x8xf32>, vector<1x16x8xf32>, vector<1x16x8xf32> -> vector<4x16x8xf32>
    %39 = vector.shape_cast %38 : vector<4x16x8xf32> to vector<8x8x8xf32>
    %40 = vector.extract_strided_slice %29 {offsets = [0, 32], sizes = [16, 8], strides = [1, 1]} : vector<16x96xf32> to vector<16x8xf32>
    %41 = vector.extract_strided_slice %29 {offsets = [0, 40], sizes = [16, 8], strides = [1, 1]} : vector<16x96xf32> to vector<16x8xf32>
    %42 = vector.extract_strided_slice %29 {offsets = [0, 48], sizes = [16, 8], strides = [1, 1]} : vector<16x96xf32> to vector<16x8xf32>
    %43 = vector.extract_strided_slice %29 {offsets = [0, 56], sizes = [16, 8], strides = [1, 1]} : vector<16x96xf32> to vector<16x8xf32>
    %44 = vector.shape_cast %40 : vector<16x8xf32> to vector<1x16x8xf32>
    %45 = vector.shape_cast %41 : vector<16x8xf32> to vector<1x16x8xf32>
    %46 = vector.shape_cast %42 : vector<16x8xf32> to vector<1x16x8xf32>
    %47 = vector.shape_cast %43 : vector<16x8xf32> to vector<1x16x8xf32>
    %48 = tpu.concatenate %44, %45, %46, %47 in 0 : vector<1x16x8xf32>, vector<1x16x8xf32>, vector<1x16x8xf32>, vector<1x16x8xf32> -> vector<4x16x8xf32>
    %49 = vector.shape_cast %48 : vector<4x16x8xf32> to vector<8x8x8xf32>
    %50 = vector.extract_strided_slice %29 {offsets = [0, 64], sizes = [16, 8], strides = [1, 1]} : vector<16x96xf32> to vector<16x8xf32>
    %51 = vector.extract_strided_slice %29 {offsets = [0, 72], sizes = [16, 8], strides = [1, 1]} : vector<16x96xf32> to vector<16x8xf32>
    %52 = vector.extract_strided_slice %29 {offsets = [0, 80], sizes = [16, 8], strides = [1, 1]} : vector<16x96xf32> to vector<16x8xf32>
    %53 = vector.extract_strided_slice %29 {offsets = [0, 88], sizes = [16, 8], strides = [1, 1]} : vector<16x96xf32> to vector<16x8xf32>
    %54 = vector.shape_cast %50 : vector<16x8xf32> to vector<1x16x8xf32>
    %55 = vector.shape_cast %51 : vector<16x8xf32> to vector<1x16x8xf32>
    %56 = vector.shape_cast %52 : vector<16x8xf32> to vector<1x16x8xf32>
    %57 = vector.shape_cast %53 : vector<16x8xf32> to vector<1x16x8xf32>
    %58 = tpu.concatenate %54, %55, %56, %57 in 0 : vector<1x16x8xf32>, vector<1x16x8xf32>, vector<1x16x8xf32>, vector<1x16x8xf32> -> vector<4x16x8xf32>
    %59 = vector.shape_cast %58 : vector<4x16x8xf32> to vector<8x8x8xf32>
    "tpu.trace_start"() <{level = 10 : i32, message = "xqd,xkd->xqk"}> : () -> ()
    %cst_14 = arith.constant dense<0.000000e+00> : vector<8x8x8xf32>
    %60 = tpu.matmul %39, %49, %cst_14 {dimension_numbers = #tpu.dot_dimension_numbers<[2], [2], [1], [1], [0, 0, 0, 1, 1, 1], [0], [0]>} : vector<8x8x8xf32>, vector<8x8x8xf32>, vector<8x8x8xf32> -> vector<8x8x8xf32>
    "tpu.trace_stop"() : () -> ()
    %cst_15 = arith.constant dense<0xFF800000> : vector<8x8xf32>
    %61 = vector.multi_reduction <maximumf>, %60, %cst_15 [2] : vector<8x8x8xf32> to vector<8x8xf32>
    %62 = vector.shape_cast %61 : vector<8x8xf32> to vector<8x8x1xf32>
    %63 = vector.broadcast %62 : vector<8x8x1xf32> to vector<8x8x8xf32>
    %64 = arith.subf %60, %63 : vector<8x8x8xf32>
    %65 = math.exp %64 : vector<8x8x8xf32>
    %cst_16 = arith.constant dense<0.000000e+00> : vector<8x8xf32>
    %66 = vector.multi_reduction <add>, %65, %cst_16 [2] : vector<8x8x8xf32> to vector<8x8xf32>
    %67 = vector.shape_cast %66 : vector<8x8xf32> to vector<8x8x1xf32>
    %cst_17 = arith.constant 1.000000e+00 : f32
    %68 = vector.broadcast %cst_17 : f32 to vector<8x8x1xf32>
    %69 = arith.divf %68, %67 : vector<8x8x1xf32>
    %70 = vector.broadcast %69 : vector<8x8x1xf32> to vector<8x8x8xf32>
    %71 = arith.mulf %65, %70 : vector<8x8x8xf32>
    %c0_18 = arith.constant 0 : index
    %c0_19 = arith.constant 0 : index
    %c0_20 = arith.constant 0 : index
    %72 = vector.load %arg14[%c0_18, %c0_19, %c0_20] : memref<8x8x8xf32, #tpu.memory_space<vmem>>, vector<8x8x8xf32>
    tpu.vector_store %arg14[%c0_18, %c0_19, %c0_20], %71 {strides = array<i32>} : memref<8x8x8xf32, #tpu.memory_space<vmem>>, vector<8x8x8xf32>,
    "tpu.trace_start"() <{level = 10 : i32, message = "xqk,xkd->xqd"}> : () -> ()
    %cst_21 = arith.constant dense<0.000000e+00> : vector<8x8x8xf32>
    %73 = tpu.matmul %71, %59, %cst_21 {dimension_numbers = #tpu.dot_dimension_numbers<[2], [1], [1], [2], [0, 0, 0, 1, 1, 2], [0], [0]>} : vector<8x8x8xf32>, vector<8x8x8xf32>, vector<8x8x8xf32> -> vector<8x8x8xf32>
    "tpu.trace_stop"() : () -> ()
    %74 = vector.shape_cast %73 : vector<8x8x8xf32> to vector<4x16x8xf32>
    %c0_22 = arith.constant 0 : index
    %c0_23 = arith.constant 0 : index
    %75 = vector.load %arg5[%c0_22, %c0_23] : memref<32x32xf32, #tpu.memory_space<vmem>>, vector<32x32xf32>
    %76 = vector.shape_cast %75 : vector<32x32xf32> to vector<4x8x32xf32>
    "tpu.trace_start"() <{level = 10 : i32, message = "hrd,hdo->hro"}> : () -> ()
    %cst_24 = arith.constant dense<0.000000e+00> : vector<4x16x32xf32>
    %77 = tpu.matmul %74, %76, %cst_24 {dimension_numbers = #tpu.dot_dimension_numbers<[2], [1], [1], [2], [0, 0, 0, 1, 1, 2], [0], [0]>} : vector<4x16x8xf32>, vector<4x8x32xf32>, vector<4x16x32xf32> -> vector<4x16x32xf32>
    "tpu.trace_stop"() : () -> ()
    %cst_25 = arith.constant dense<0.000000e+00> : vector<16x32xf32>
    %78 = vector.multi_reduction <add>, %77, %cst_25 [0] : vector<4x16x32xf32> to vector<16x32xf32>
    %c0_26 = arith.constant 0 : index
    %c0_27 = arith.constant 0 : index
    %79 = vector.load %arg6[%c0_26, %c0_27] : memref<1x32xf32, #tpu.memory_space<vmem>>, vector<1x32xf32>
    %80 = vector.broadcast %79 : vector<1x32xf32> to vector<16x32xf32>
    %81 = arith.addf %78, %80 : vector<16x32xf32>
    %82 = arith.addf %81, %0 : vector<16x32xf32>
    %c0_28 = arith.constant 0 : index
    %c0_29 = arith.constant 0 : index
    %83 = vector.load %arg7[%c0_28, %c0_29] : memref<1x32xf32, #tpu.memory_space<vmem>>, vector<1x32xf32>
    %c0_30 = arith.constant 0 : index
    %c0_31 = arith.constant 0 : index
    %84 = vector.load %arg8[%c0_30, %c0_31] : memref<1x32xf32, #tpu.memory_space<vmem>>, vector<1x32xf32>
    %cst_32 = arith.constant dense<0.000000e+00> : vector<16xf32>
    %85 = vector.multi_reduction <add>, %82, %cst_32 [1] : vector<16x32xf32> to vector<16xf32>
    %86 = vector.shape_cast %85 : vector<16xf32> to vector<16x1xf32>
    %cst_33 = arith.constant 3.200000e+01 : f32
    %87 = vector.broadcast %cst_33 : f32 to vector<16x1xf32>
    %88 = arith.divf %86, %87 : vector<16x1xf32>
    %89 = arith.mulf %82, %82 : vector<16x32xf32>
    %cst_34 = arith.constant dense<0.000000e+00> : vector<16xf32>
    %90 = vector.multi_reduction <add>, %89, %cst_34 [1] : vector<16x32xf32> to vector<16xf32>
    %91 = vector.shape_cast %90 : vector<16xf32> to vector<16x1xf32>
    %cst_35 = arith.constant 3.200000e+01 : f32
    %92 = vector.broadcast %cst_35 : f32 to vector<16x1xf32>
    %93 = arith.divf %91, %92 : vector<16x1xf32>
    %94 = arith.mulf %88, %88 : vector<16x1xf32>
    %95 = arith.subf %93, %94 : vector<16x1xf32>
    %96 = vector.broadcast %88 : vector<16x1xf32> to vector<16x32xf32>
    %97 = arith.subf %82, %96 : vector<16x32xf32>
    %cst_36 = arith.constant 9.99999997E-7 : f32
    %98 = vector.broadcast %cst_36 : f32 to vector<16x1xf32>
    %99 = arith.addf %95, %98 : vector<16x1xf32>
    %100 = math.rsqrt %99 : vector<16x1xf32>
    %101 = vector.broadcast %100 : vector<16x1xf32> to vector<16x32xf32>
    %102 = arith.mulf %97, %101 : vector<16x32xf32>
    %103 = vector.broadcast %83 : vector<1x32xf32> to vector<16x32xf32>
    %104 = arith.mulf %102, %103 : vector<16x32xf32>
    %105 = vector.broadcast %84 : vector<1x32xf32> to vector<16x32xf32>
    %106 = arith.addf %104, %105 : vector<16x32xf32>
    %c0_37 = arith.constant 0 : index
    %c0_38 = arith.constant 0 : index
    %107 = vector.load %arg9[%c0_37, %c0_38] : memref<32x64xf32, #tpu.memory_space<vmem>>, vector<32x64xf32>
    %cst_39 = arith.constant dense<0.000000e+00> : vector<16x64xf32>
    %108 = tpu.matmul %106, %107, %cst_39 {dimension_numbers = #tpu.dot_dimension_numbers<[1], [0], [0], [1], [0, 0, 1, 1], [], []>} : vector<16x32xf32>, vector<32x64xf32>, vector<16x64xf32> -> vector<16x64xf32>
    %c0_40 = arith.constant 0 : index
    %c0_41 = arith.constant 0 : index
    %109 = vector.load %arg10[%c0_40, %c0_41] : memref<1x64xf32, #tpu.memory_space<vmem>>, vector<1x64xf32>
    %110 = vector.broadcast %109 : vector<1x64xf32> to vector<16x64xf32>
    %111 = arith.addf %108, %110 : vector<16x64xf32>
    %cst_42 = arith.constant 5.000000e-01 : f32
    %112 = vector.broadcast %cst_42 : f32 to vector<16x64xf32>
    %113 = arith.mulf %112, %111 : vector<16x64xf32>
    %cst_43 = arith.constant 0.707106769 : f32
    %114 = vector.broadcast %cst_43 : f32 to vector<16x64xf32>
    %115 = arith.mulf %111, %114 : vector<16x64xf32>
    %116 = math.erf %115 : vector<16x64xf32>
    %cst_44 = arith.constant 1.000000e+00 : f32
    %117 = vector.broadcast %cst_44 : f32 to vector<16x64xf32>
    %118 = arith.addf %117, %116 : vector<16x64xf32>
    %119 = arith.mulf %113, %118 : vector<16x64xf32>
    %c0_45 = arith.constant 0 : index
    %c0_46 = arith.constant 0 : index
    %120 = vector.load %arg11[%c0_45, %c0_46] : memref<64x32xf32, #tpu.memory_space<vmem>>, vector<64x32xf32>
    %cst_47 = arith.constant dense<0.000000e+00> : vector<16x32xf32>
    %121 = tpu.matmul %119, %120, %cst_47 {dimension_numbers = #tpu.dot_dimension_numbers<[1], [0], [0], [1], [0, 0, 1, 1], [], []>} : vector<16x64xf32>, vector<64x32xf32>, vector<16x32xf32> -> vector<16x32xf32>
    %c0_48 = arith.constant 0 : index
    %c0_49 = arith.constant 0 : index
    %122 = vector.load %arg12[%c0_48, %c0_49] : memref<1x32xf32, #tpu.memory_space<vmem>>, vector<1x32xf32>
    %123 = vector.broadcast %122 : vector<1x32xf32> to vector<16x32xf32>
    %124 = arith.addf %121, %123 : vector<16x32xf32>
    %125 = arith.addf %124, %82 : vector<16x32xf32>
    %c0_50 = arith.constant 0 : index
    %c0_51 = arith.constant 0 : index
    %126 = vector.load %arg13[%c0_50, %c0_51] : memref<16x32xf32, #tpu.memory_space<vmem>>, vector<16x32xf32>
    tpu.vector_store %arg13[%c0_50, %c0_51], %125 {strides = array<i32>} : memref<16x32xf32, #tpu.memory_space<vmem>>, vector<16x32xf32>,
    return
  }
}

</mosaic_0001>

<bundles_post_ra>
// kernel: tpu_custom_call.1
= control target key start
LH: loop header
LB: loop body
LE: loop exit
PB: predicated region body
PF: predicated region fallthrough
CT: control target
= control target key end

     0   :  { %20 = vsyncpa [#allocation3], 0  ;;  %s1874_s0 = inlined_call_operand.hbm [shape: f32[16,32], index: 0, kind: input, shape index: {}]   ;;  %s1875_s1 = inlined_call_operand.hbm [shape: f32[1,32], index: 1, kind: input, shape index: {}]   ;;  %s1876_s2 = inlined_call_operand.vmem [shape: f32[1,32], index: 2, kind: input, shape index: {}]   ;;  %s1877_s3 = inlined_call_operand.vmem [shape: f32[32,96], index: 3, kind: input, shape index: {}]   ;;  %s1878_s4 = inlined_call_operand.vmem [shape: f32[1,96], index: 4, kind: input, shape index: {}]   ;;  %s1879_s5 = inlined_call_operand.vmem [shape: f32[32,32], index: 5, kind: input, shape index: {}]   ;;  %s1880_s6 = inlined_call_operand.vmem [shape: f32[1,32], index: 6, kind: input, shape index: {}]   ;;  %s1881_s7 = inlined_call_operand.vmem [shape: f32[1,32], index: 7, kind: input, shape index: {}]   ;;  %s1882_s8 = inlined_call_operand.vmem [shape: f32[1,32], index: 8, kind: input, shape index: {}]   ;;  %s1883_s9 = inlined_call_operand.vmem [shape: f32[32,64], index: 9, kind: input, shape index: {}]   ;;  %s1884_s10 = inlined_call_operand.vmem [shape: f32[1,64], index: 10, kind: input, shape index: {}]   ;;  %s1885_s11 = inlined_call_operand.vmem [shape: f32[64,32], index: 11, kind: input, shape index: {}]   ;;  %s1886_s12 = inlined_call_operand.vmem [shape: f32[1,32], index: 12, kind: input, shape index: {}]   ;;  %s1887_s13 = inlined_call_operand.hbm [shape: f32[16,32], index: 13, kind: output, shape index: {0}]   ;;  %s1888_s14 = inlined_call_operand.hbm [shape: f32[8,8,8], index: 14, kind: output, shape index: {1}]  }
   0x1   :  { %21 = vsyncpa [#allocation6], 0 }
   0x2   :  { %22 = vsyncpa [#allocation4], 0 }
   0x3   :  { %23 = vsyncpa [#allocation9], 0  ;;  %s28_s15 = sshll.u32 %s1874_s0, 4  ;;  %s1460_s16 = smov [#allocation2]   ;;  %s29_s15 = int_to_ptr.hbm [resolvable:$true] %s28_s15 }
   0x4   :  { %s30_s17 = sshll.u32 %s1460_s16, 4  ;;  %s42_s20 = sshll.u32 %s1875_s1, 4  ;;  %s31_s17 = int_to_ptr.vmem [resolvable:$true] %s30_s17  ;;  %s43_s20 = int_to_ptr.hbm [resolvable:$true] %s42_s20 }
   0x5   :  { %s1461_s21 = smov 128   ;;  %s1462_s22 = smov 8  }
   0x6   :  { %36 = dma.hbm_to_vmem [thread:$0]  %s29_s15, 256, %s31_s17, [#allocation3], %s1461_s21, %s1461_s21, %s1462_s22  }
   0x7   :  { %s1463_s23 = smov [#allocation5]  }
   0x8   :  { %s44_s24 = sshll.u32 %s1463_s23, 4  ;;  %s45_s24 = int_to_ptr.vmem [resolvable:$true] %s44_s24 }
   0x9   :  { %47 = dma.hbm_to_vmem [thread:$0]  %s43_s20, 16, %s45_s24, [#allocation6]  }
   0xa   :  { %1452 = dma.done.wait [#allocation3], 256  }
   0xb   :  { %1453 = vsyncadd [#allocation3], 4294967040 }
   0xc   :  { %1454 = dma.done.wait [#allocation6], 16  }
   0xd   :  { %1455 = vsyncadd [#allocation6], 4294967280  ;;  %vm82_vm0 = vcmask 261120   ;;  %v1556_v0 = vld [vmem:[#allocation2 + $0x8] sm:$0xff]  ;;  %v1558_v1 = vld [vmem:[#allocation2] sm:$0xff]  ;;  %v1464_v8 = vmov 32.0  }
   0xe   :  { %v86_v2 = vsel %vm82_vm0, %v1556_v0, 0.0  ;;  %v83_v3 = vsel %vm82_vm0, %v1558_v1, 0.0  ;;  %v99_v4 = vmul.f32 %v1556_v0, %v1556_v0  ;;  %v98_v5 = vmul.f32 %v1558_v1, %v1558_v1  ;;  %v151_v14 = vld [vmem:[%s1877_s3 + $0x18] sm:$0xff]  ;;  %v150_v15 = vld [vmem:[%s1877_s3 + $0x10] sm:$0xff]  ;;  %v149_v18 = vld [vmem:[%s1877_s3 + $0x8] sm:$0xff]  ;;  %s1466_s18 = smov 104  }
   0xf   :  { %87 = vadd.xlane.f32.xlu1 %v86_v2  ;;  %84 = vadd.xlane.f32.xlu0 %v83_v3  ;;  %1310 = vrcp.f32 %v1464_v8  ;;  %v148_v21 = vld [vmem:[%s1877_s3] sm:$0xff]  ;;  %v1302_v46 = vld [vmem:[#allocation5] ss:$0 sm:$0xff]  ;;  %s1467_s19 = smov 112   ;;  %s1468_s20 = smov 96   ;;  %vm201_vm8 = vcmask 64512  }
  0x10   :  { %v103_v6 = vsel %vm82_vm0, %v99_v4, 0.0  ;;  %v100_v7 = vsel %vm82_vm0, %v98_v5, 0.0  ;;  %174 = vmatpush.msra.mxu0 %v151_v14  ;;  %v1303_v49 = vld [vmem:[%s1876_s2] ss:$0 sm:$0xff]  ;;  %s1465_s2 = smov 120   ;;  %s1203_s23 = sshll.u32 %s1887_s13, 4  ;;  %s1204_s23 = int_to_ptr.hbm [resolvable:$true] %s1203_s23 }
  0x11   :  { %v1304_v57 = vld [vmem:[%s1878_s4] ss:$0 sm:$0xff]  ;;  %s1469_s4 = smov 64  }
  0x12   :  { %175 = vmatpush.msra.mxu0 %v150_v15 }
  0x14   :  { %176 = vmatpush.msra.mxu0 %v149_v18 }
  0x15   :  { %v1311_v9 = vpop.eup %1310 }
  0x16   :  { %v90_v10 = vmul.f32 32.0, %v1311_v9  ;;  %vm94_vm1 = vweird.f32 %v1311_v9  ;;  %177 = vmatpush.msra.mxu0 %v148_v21 }
  0x17   :  { %104 = vadd.xlane.f32.xlu1 %v103_v6  ;;  %101 = vadd.xlane.f32.xlu0 %v100_v7 }
  0x18   :  { %v91_v11 = vsub.f32 1.0, %v90_v10 }
  0x1a   :  { %v92_v12 = vmul.f32 %v1311_v9, %v91_v11 }
  0x1c   :  { %v93_v13 = vadd.f32 %v1311_v9, %v92_v12 }
  0x1e   :  { %v1579_v19 = vsel %vm94_vm1, %v1311_v9, %v93_v13 }
  0x82   :  { %v88_v16 = vpop.xlane.xlu1 %87  ;;  %v85_v17 = vpop.xlane.xlu0 %84 }
  0x83   :  { %v97_v20 = vmul.f32 %v1579_v19, %v88_v16  ;;  %v96_v22 = vmul.f32 %v1579_v19, %v85_v17 }
  0x85   :  { %v109_v23 = vmul.f32 %v97_v20, %v97_v20  ;;  %v108_v26 = vmul.f32 %v96_v22, %v96_v22  ;;  %v112_v45 = vsub.f32 %v1558_v1, %v96_v22  ;;  %v113_v51 = vsub.f32 %v1556_v0, %v97_v20 }
  0x8a   :  { %v105_v24 = vpop.xlane.xlu1 %104  ;;  %v102_v25 = vpop.xlane.xlu0 %101 }
  0x8b   :  { %v107_v27 = vmul.f32 %v105_v24, %v1579_v19  ;;  %v106_v28 = vmul.f32 %v102_v25, %v1579_v19 }
  0x8d   :  { %v111_v29 = vsub.f32 %v107_v27, %v109_v23  ;;  %v110_v30 = vsub.f32 %v106_v28, %v108_v26 }
  0x8f   :  { %v115_v31 = vadd.f32 1e-06, %v111_v29  ;;  %v114_v32 = vadd.f32 1e-06, %v110_v30 }
  0x91   :  { %1312 = vrsqrt.f32 %v115_v31  ;;  %vm122_vm4 = vweird.f32 %v114_v32  ;;  %vm132_vm6 = vweird.f32 %v115_v31 }
  0x92   :  { %1314 = vrsqrt.f32 %v114_v32 }
  0x97   :  { %v1313_v33 = vpop.eup %1312 }
  0x98   :  { %v1315_v34 = vpop.eup %1314  ;;  %v127_v35 = vmul.f32 %v1313_v33, %v115_v31  ;;  %vm133_vm3 = vweird.f32 %v1313_v33 }
  0x99   :  { %v117_v36 = vmul.f32 %v1315_v34, %v114_v32  ;;  %vm123_vm2 = vweird.f32 %v1315_v34  ;;  %vm134_vm7 = vmor %vm132_vm6, %vm133_vm3 }
  0x9a   :  { %v128_v37 = vmul.f32 %v1313_v33, %v127_v35  ;;  %vm124_vm5 = vmor %vm122_vm4, %vm123_vm2 }
  0x9b   :  { %v118_v38 = vmul.f32 %v1315_v34, %v117_v36 }
  0x9c   :  { %v129_v39 = vmul.f32 0.5, %v128_v37 }
  0x9d   :  { %v119_v40 = vmul.f32 0.5, %v118_v38 }
  0x9e   :  { %v130_v41 = vsub.f32 1.5, %v129_v39 }
  0x9f   :  { %v120_v42 = vsub.f32 1.5, %v119_v40 }
  0xa0   :  { %v131_v43 = vmul.f32 %v1313_v33, %v130_v41 }
  0xa1   :  { %v121_v44 = vmul.f32 %v1315_v34, %v120_v42 }
  0xa2   :  { %v135_v50 = vsel %vm134_vm7, %v1313_v33, %v131_v43 }
  0xa3   :  { %v125_v47 = vsel %vm124_vm5, %v1315_v34, %v121_v44  ;;  %v137_v54 = vmul.f32 %v135_v50, %v113_v51 }
  0xa4   :  { %v136_v48 = vmul.f32 %v125_v47, %v112_v45 }
  0xa5   :  { %v142_v55 = vmul.f32 %v1302_v46, %v137_v54 }
  0xa6   :  { %v141_v52 = vmul.f32 %v1302_v46, %v136_v48 }
  0xa7   :  { %v147_v56 = vadd.f32 %v1303_v49, %v142_v55 }
  0xa8   :  { %v146_v53 = vadd.f32 %v1303_v49, %v141_v52 }
  0xaa   :  { %1235 = vmatmul.msk.f32.vlgmr.msra.gmra.mxu0 %vm82_vm0, %v146_v53 }
  0xb2   :  { %1236 = vmatmul.msk.f32.gmra.mxu0 %vm82_vm0, %v147_v56 }
 0x127   :  { %v179_v58 = vpop.f32.mrf.mxu0 }
 0x128   :  { %v1598_v59 = vadd.f32 %v1304_v57, %v179_v58 }
 0x12a   :  { %187 = vrot.lane.b32.xlu2 %v1598_v59, %s1465_s2 }
 0x12f   :  { %v182_v60 = vpop.f32.mrf.mxu0 }
 0x130   :  { %v1601_v61 = vadd.f32 %v1304_v57, %v182_v60 }
 0x132   :  { %197 = vrot.lane.b32.xlu1 %v1601_v61, %s1466_s18  ;;  %189 = vrot.lane.b32.xlu0 %v1601_v61, %s1465_s2  ;;  %v1287_v42 = vpack.i.bf16 %v1598_v59, %v1601_v61 }
 0x133   :  { %191 = vrot.lane.b32.xlu2 %v1598_v59, %s1467_s19 }
 0x13a   :  { %199 = vrot.lane.b32.xlu0 %v1598_v59, %s1468_s20 }
 0x13b   :  { %195 = vrot.lane.b32.xlu2 %v1598_v59, %s1466_s18 }
 0x143   :  { %193 = vrot.lane.b32.xlu2 %v1601_v61, %s1467_s19 }
 0x14b   :  { %226 = vrot.lane.b32.xlu2 %v1601_v61, %s1468_s20 }
 0x184   :  { %v1610_v62 = vpop.permute.xlu2 %187 }
 0x185   :  { %252 = vrot.lane.b32.xlu2 %v1610_v62, %s1468_s20 }
 0x18d   :  { %v1613_v63 = vpop.permute.xlu2 %191 }
 0x18e   :  { %304 = vrot.lane.b32.xlu1 %v1613_v63, %s1468_s20 }
 0x195   :  { %v1616_v2 = vpop.permute.xlu2 %195 }
 0x196   :  { %356 = vrot.lane.b32.xlu1 %v1616_v2, %s1468_s20 }
 0x19d   :  { %v1619_v3 = vpop.permute.xlu2 %193 }
 0x1a4   :  { %v1621_v4 = vpop.permute.xlu1 %197  ;;  %v1623_v5 = vpop.permute.xlu0 %189 }
 0x1a5   :  { %v227_v6 = vpop.permute.xlu2 %226  ;;  %278 = vrot.lane.b32.xlu0 %v1623_v5, %s1468_s20  ;;  %382 = vrot.lane.b32.xlu2 %v1621_v4, %s1468_s20  ;;  %v1292_v41 = vpack.i.bf16 %v1623_v5, %v1610_v62 }
 0x1a6   :  { %1239 = vmatpush.xpose.msk.msra.mxu2 %vm201_vm8, %v227_v6 }
 0x1a9   :  { %1240 = vmatmul.msk.f32.vlgmr.msra.gmra.mxu2 %vm201_vm8, %v1601_v61 }
 0x1ac   :  { %v200_v7 = vpop.permute.xlu0 %199 }
 0x1ad   :  { %1237 = vmatpush.xpose.msk.msra.mxu1 %vm201_vm8, %v200_v7  ;;  %330 = vrot.lane.b32.xlu0 %v1619_v3, %s1468_s20 }
 0x1b0   :  { %1238 = vmatmul.msk.f32.vlgmr.msra.gmra.mxu1 %vm201_vm8, %v1598_v59 }
 0x1df   :  { %v253_v8 = vpop.permute.xlu2 %252 }
 0x1e0   :  { %1241 = vmatpush.xpose.msk.msra.mxu3 %vm201_vm8, %v253_v8 }
 0x1e3   :  { %1242 = vmatmul.msk.f32.vlgmr.msra.gmra.mxu3 %vm201_vm8, %v1610_v62 }
 0x1ff   :  { %v383_v9 = vpop.permute.xlu2 %382 }
 0x200   :  { %v305_v10 = vpop.permute.xlu1 %304 }
 0x201   :  { %1245 = vmatpush.xpose.msk.msrb.mxu2 %vm201_vm8, %v305_v10 }
 0x204   :  { %1246 = vmatmul.msk.f32.vlgmr.msrb.gmra.mxu2 %vm201_vm8, %v1613_v63 }
 0x205   :  { %1251 = vmatpush.xpose.msk.msra.mxu2 %vm201_vm8, %v383_v9 }
 0x208   :  { %v357_v12 = vpop.permute.xlu1 %356 }
 0x20c   :  { %1252 = vmatmul.msk.f32.vlgmr.msra.gmra.mxu2 %vm201_vm8, %v1621_v4 }
 0x217   :  { %v279_v11 = vpop.permute.xlu0 %278 }
 0x218   :  { %1243 = vmatpush.xpose.msk.msrb.mxu1 %vm201_vm8, %v279_v11 }
 0x21b   :  { %1244 = vmatmul.msk.f32.vlgmr.msrb.gmra.mxu1 %vm201_vm8, %v1623_v5 }
 0x21c   :  { %1249 = vmatpush.xpose.msk.msra.mxu1 %vm201_vm8, %v357_v12 }
 0x21f   :  { %v331_v13 = vpop.permute.xlu0 %330 }
 0x220   :  { %1247 = vmatpush.xpose.msk.msrb.mxu3 %vm201_vm8, %v331_v13 }
 0x223   :  { %1248 = vmatmul.msk.f32.vlgmr.msrb.gmra.mxu3 %vm201_vm8, %v1619_v3  ;;  %1250 = vmatmul.msk.f32.vlgmr.msra.gmra.mxu1 %vm201_vm8, %v1616_v2 }
 0x22c   :  { %v249_v14 = vpop.f32.mrf.mxu2 }
 0x22d   :  { %v223_v15 = vpop.f32.mrf.mxu1  ;;  %v411_v16 = vsel %vm201_vm8, %v249_v14, -inf }
 0x22e   :  { %412 = vmax.xlane.f32.xlu2 %v411_v16  ;;  %v408_v17 = vsel %vm201_vm8, %v223_v15, -inf }
 0x22f   :  { %409 = vmax.xlane.f32.xlu1 %v408_v17 }
 0x266   :  { %v275_v18 = vpop.f32.mrf.mxu3 }
 0x267   :  { %v414_v20 = vsel %vm201_vm8, %v275_v18, -inf }
 0x268   :  { %415 = vmax.xlane.f32.xlu0 %v414_v20 }
 0x287   :  { %v327_v21 = vpop.f32.mrf.mxu2 }
 0x288   :  { %v420_v22 = vsel %vm201_vm8, %v327_v21, -inf }
 0x289   :  { %421 = vmax.xlane.f32.xlu1 %v420_v22 }
 0x28f   :  { %v405_v39 = vpop.f32.mrf.mxu2 }
 0x290   :  { %v429_v40 = vsel %vm201_vm8, %v405_v39, -inf }
 0x298   :  { %v301_v23 = vpop.f32.mrf.mxu1 }
 0x299   :  { %v417_v24 = vsel %vm201_vm8, %v301_v23, -inf }
 0x29a   :  { %418 = vmax.xlane.f32.xlu2 %v417_v24 }
 0x2a0   :  { %v379_v25 = vpop.f32.mrf.mxu1 }
 0x2a1   :  { %v413_v26 = vpop.xlane.xlu2 %412  ;;  %v426_v27 = vsel %vm201_vm8, %v379_v25, -inf }
 0x2a2   :  { %v433_v28 = vsub.f32 %v249_v14, %v413_v26  ;;  %v410_v29 = vpop.xlane.xlu1 %409  ;;  %427 = vmax.xlane.f32.xlu0 %v426_v27 }
 0x2a3   :  { %v432_v30 = vsub.f32 %v223_v15, %v410_v29 }
 0x2a4   :  { %v442_v31 = vmul.f32 1.442695, %v433_v28 }
 0x2a5   :  { %v440_v32 = vmul.f32 1.442695, %v432_v30 }
 0x2a6   :  { %1316 = vpow2.f32 %v442_v31  ;;  %v1658_v33 = vpop.f32.mrf.mxu3 }
 0x2a7   :  { %1318 = vpow2.f32 %v440_v32  ;;  %v423_v34 = vsel %vm201_vm8, %v1658_v33, -inf }
 0x2a8   :  { %424 = vmax.xlane.f32.xlu1 %v423_v34 }
 0x2ac   :  { %v1662_v35 = vpop.eup %1316 }
 0x2ad   :  { %v1664_v36 = vpop.eup %1318  ;;  %v459_v37 = vsel %vm201_vm8, %v1662_v35, 0.0 }
 0x2ae   :  { %460 = vadd.xlane.f32.xlu0 %v459_v37  ;;  %v456_v38 = vsel %vm201_vm8, %v1664_v36, 0.0 }
 0x2af   :  { %457 = vadd.xlane.f32.xlu2 %v456_v38 }
 0x2b7   :  { %430 = vmax.xlane.f32.xlu2 %v429_v40 }
 0x2c1   :  { %1293 = vrot.lane.b32.xlu1 %v1292_v41, %s1469_s4 }
 0x2cf   :  { %1288 = vrot.lane.b32.xlu2 %v1287_v42, %s1469_s4 }
 0x2db   :  { %v416_v43 = vpop.xlane.xlu0 %415 }
 0x2dc   :  { %v434_v44 = vsub.f32 %v275_v18, %v416_v43 }
 0x2de   :  { %v444_v45 = vmul.f32 1.442695, %v434_v44 }
 0x2e0   :  { %1320 = vpow2.f32 %v444_v45  ;;  %v1297_v45 = vpack.i.bf16 %v1616_v2, %v1613_v63 }
 0x2e6   :  { %v1677_v46 = vpop.eup %1320 }
 0x2e7   :  { %v462_v47 = vsel %vm201_vm8, %v1677_v46, 0.0 }
 0x2eb   :  { %463 = vadd.xlane.f32.xlu1 %v462_v47 }
 0x2fc   :  { %v422_v48 = vpop.xlane.xlu1 %421 }
 0x2fd   :  { %v436_v49 = vsub.f32 %v327_v21, %v422_v48 }
 0x2ff   :  { %v448_v50 = vmul.f32 1.442695, %v436_v49 }
 0x301   :  { %1322 = vpow2.f32 %v448_v50 }
 0x307   :  { %v1681_v51 = vpop.eup %1322 }
 0x308   :  { %v468_v52 = vsel %vm201_vm8, %v1681_v51, 0.0 }
 0x309   :  { %469 = vadd.xlane.f32.xlu2 %v468_v52 }
 0x30d   :  { %v419_v53 = vpop.xlane.xlu2 %418 }
 0x30e   :  { %v435_v54 = vsub.f32 %v301_v23, %v419_v53 }
 0x310   :  { %v446_v55 = vmul.f32 1.442695, %v435_v54 }
 0x312   :  { %1324 = vpow2.f32 %v446_v55 }
 0x315   :  { %v428_v56 = vpop.xlane.xlu0 %427 }
 0x316   :  { %v438_v57 = vsub.f32 %v379_v25, %v428_v56 }
 0x318   :  { %v1685_v58 = vpop.eup %1324  ;;  %v452_v59 = vmul.f32 1.442695, %v438_v57 }
 0x319   :  { %v465_v60 = vsel %vm201_vm8, %v1685_v58, 0.0 }
 0x31a   :  { %1326 = vpow2.f32 %v452_v59  ;;  %466 = vadd.xlane.f32.xlu0 %v465_v60 }
 0x31b   :  { %v425_v12 = vpop.xlane.xlu1 %424 }
 0x31c   :  { %v437_v21 = vsub.f32 %v1658_v33, %v425_v12 }
 0x31e   :  { %v450_v29 = vmul.f32 1.442695, %v437_v21 }
 0x320   :  { %v1689_v61 = vpop.eup %1326 }
 0x321   :  { %798 = vrot.lane.b32.xlu2 %v1621_v4, %s1469_s4  ;;  %v461_v62 = vpop.xlane.xlu0 %460  ;;  %v474_v5 = vsel %vm201_vm8, %v1689_v61, 0.0 }
 0x322   :  { %1328 = vrcp.f32 %v461_v62  ;;  %475 = vadd.xlane.f32.xlu1 %v474_v5  ;;  %v458_v6 = vpop.xlane.xlu2 %457  ;;  %v504_v15 = vand.u32 2147483647, %v461_v62  ;;  %v506_v16 = vand.u32 2147483648, %v461_v62  ;;  %vm500_vm11 = vweird.f32 %v461_v62 }
 0x323   :  { %1330 = vrcp.f32 %v458_v6  ;;  %v491_v18 = vand.u32 2147483648, %v458_v6  ;;  %v489_v23 = vand.u32 2147483647, %v458_v6  ;;  %vm485_vm13 = vweird.f32 %v458_v6 }
 0x324   :  { %v507_v25 = vor.u32 1.1754944e-38, %v506_v16  ;;  %vm505_vm14 = vcmp.eq.f32.partialorder %v504_v15, 8.507059e+37 }
 0x325   :  { %v492_v28 = vor.u32 1.1754944e-38, %v491_v18  ;;  %vm490_vm1 = vcmp.eq.f32.partialorder %v489_v23, 8.507059e+37 }
 0x328   :  { %v1329_v7 = vpop.eup %1328 }
 0x329   :  { %v1331_v8 = vpop.eup %1330  ;;  %v496_v9 = vmul.f32 %v1329_v7, %v461_v62  ;;  %vm501_vm9 = vweird.f32 %v1329_v7 }
 0x32a   :  { %v481_v10 = vmul.f32 %v1331_v8, %v458_v6  ;;  %v431_v11 = vpop.xlane.xlu2 %430  ;;  %vm486_vm10 = vweird.f32 %v1331_v8  ;;  %vm502_vm12 = vmor %vm500_vm11, %vm501_vm9 }
 0x32b   :  { %v497_v13 = vsub.f32 1.0, %v496_v9  ;;  %v439_v14 = vsub.f32 %v405_v39, %v431_v11  ;;  %vm487_vm15 = vmor %vm485_vm13, %vm486_vm10 }
 0x32c   :  { %v482_v17 = vsub.f32 1.0, %v481_v10 }
 0x32d   :  { %v498_v4 = vmul.f32 %v1329_v7, %v497_v13  ;;  %v454_v20 = vmul.f32 1.442695, %v439_v14 }
 0x32e   :  { %v483_v22 = vmul.f32 %v1331_v8, %v482_v17 }
 0x32f   :  { %v499_v24 = vadd.f32 %v1329_v7, %v498_v4  ;;  %1332 = vpow2.f32 %v454_v20 }
 0x330   :  { %v484_v26 = vadd.f32 %v1331_v8, %v483_v22  ;;  %1334 = vpow2.f32 %v450_v29 }
 0x331   :  { %v503_v27 = vsel %vm502_vm12, %v1329_v7, %v499_v24 }
 0x332   :  { %v508_v30 = vsel %vm505_vm14, %v507_v25, %v503_v27  ;;  %v488_v31 = vsel %vm487_vm15, %v1331_v8, %v484_v26  ;;  %v1289_v32 = vpop.permute.xlu2 %1288 }
 0x333   :  { %v493_v33 = vsel %vm490_vm1, %v492_v28, %v488_v31  ;;  %v1291_v34 = vunpack.i.h.bf16 %v1289_v32  ;;  %v1290_v37 = vunpack.i.l.bf16 %v1289_v32  ;;  %v1294_v38 = vpop.permute.xlu1 %1293  ;;  %v601_v39 = vmul.f32 %v1662_v35, %v508_v30 }
 0x334   :  { %v1296_v40 = vunpack.i.h.bf16 %v1294_v38  ;;  %v1295_v41 = vunpack.i.l.bf16 %v1294_v38  ;;  %v600_v42 = vmul.f32 %v1664_v36, %v493_v33 }
 0x335   :  { %v1698_v43 = vpop.eup %1332  ;;  %637 = vmatpush.msra.mxu3 %v1291_v34  ;;  %663 = vmatpush.msrb.mxu1 %v1290_v37  ;;  %609 = vst.msk [vmem:[#allocation8 + $0x8] sm:$0xff] %vm201_vm8, %v601_v39 }
 0x336   :  { %608 = vst.msk [vmem:[#allocation8] sm:$0xff] %vm201_vm8, %v600_v42  ;;  %1253 = vmatmul.msk.f32.vlgmr.msra.gmra.mxu3 %vm201_vm8, %v600_v42  ;;  %1254 = vmatmul.msk.f32.vlgmr.msrb.gmra.mxu1 %vm201_vm8, %v601_v39  ;;  %v477_v35 = vsel %vm201_vm8, %v1698_v43, 0.0  ;;  %v1708_v36 = vpop.eup %1334 }
 0x337   :  { %689 = vmatpush.msra.mxu1 %v1295_v41  ;;  %715 = vmatpush.msrb.mxu2 %v1296_v40  ;;  %v471_v44 = vsel %vm201_vm8, %v1708_v36, 0.0 }
 0x338   :  { %478 = vadd.xlane.f32.xlu0 %v477_v35 }
 0x33b   :  { %746 = vrot.lane.b32.xlu1 %v1619_v3, %s1469_s4 }
 0x340   :  { %472 = vadd.xlane.f32.xlu0 %v471_v44 }
 0x354   :  { %1298 = vrot.lane.b32.xlu0 %v1297_v45, %s1469_s4  ;;  %s1471_s4 = smov [#allocation7]  }
 0x35e   :  { %v464_v47 = vpop.xlane.xlu1 %463 }
 0x35f   :  { %1336 = vrcp.f32 %v464_v47  ;;  %v521_v52 = vand.u32 2147483648, %v464_v47  ;;  %v519_v3 = vand.u32 2147483647, %v464_v47  ;;  %vm515_vm3 = vweird.f32 %v464_v47 }
 0x361   :  { %v522_v55 = vor.u32 1.1754944e-38, %v521_v52  ;;  %vm520_vm5 = vcmp.eq.f32.partialorder %v519_v3, 8.507059e+37 }
 0x365   :  { %v1337_v48 = vpop.eup %1336 }
 0x366   :  { %v511_v49 = vmul.f32 %v1337_v48, %v464_v47  ;;  %vm516_vm2 = vweird.f32 %v1337_v48 }
 0x367   :  { %vm517_vm4 = vmor %vm515_vm3, %vm516_vm2 }
 0x368   :  { %v512_v50 = vsub.f32 1.0, %v511_v49 }
 0x36a   :  { %v513_v53 = vmul.f32 %v1337_v48, %v512_v50 }
 0x36c   :  { %v514_v54 = vadd.f32 %v1337_v48, %v513_v53 }
 0x36e   :  { %v518_v56 = vsel %vm517_vm4, %v1337_v48, %v514_v54 }
 0x36f   :  { %v523_v57 = vsel %vm520_vm5, %v522_v55, %v518_v56 }
 0x370   :  { %v602_v63 = vmul.f32 %v1677_v46, %v523_v57 }
 0x372   :  { %610 = vst.msk [vmem:[#allocation8 + $0x10] sm:$0xff] %vm201_vm8, %v602_v63  ;;  %1255 = vmatmul.msk.f32.vlgmr.msra.gmra.mxu1 %vm201_vm8, %v602_v63 }
 0x37c   :  { %v470_v2 = vpop.xlane.xlu2 %469 }
 0x37d   :  { %1338 = vrcp.f32 %v470_v2  ;;  %v551_v6 = vand.u32 2147483648, %v470_v2  ;;  %v549_v8 = vand.u32 2147483647, %v470_v2  ;;  %vm545_vm7 = vweird.f32 %v470_v2 }
 0x37f   :  { %v552_v10 = vor.u32 1.1754944e-38, %v551_v6  ;;  %vm550_vm10 = vcmp.eq.f32.partialorder %v549_v8, 8.507059e+37  ;;  %v824_v6 = vld [vmem:[%s1879_s5] sm:$0xff] }
 0x383   :  { %v1339_v59 = vpop.eup %1338 }
 0x384   :  { %v541_v60 = vmul.f32 %v1339_v59, %v470_v2  ;;  %v799_v62 = vpop.permute.xlu2 %798  ;;  %vm546_vm6 = vweird.f32 %v1339_v59 }
 0x385   :  { %819 = vmatpush.msra.mxu2 %v799_v62  ;;  %vm547_vm9 = vmor %vm545_vm7, %vm546_vm6 }
 0x386   :  { %v542_v5 = vsub.f32 1.0, %v541_v60 }
 0x388   :  { %v543_v7 = vmul.f32 %v1339_v59, %v542_v5 }
 0x38a   :  { %v544_v9 = vadd.f32 %v1339_v59, %v543_v7 }
 0x38c   :  { %v548_v46 = vsel %vm547_vm9, %v1339_v59, %v544_v9 }
 0x38d   :  { %v553_v11 = vsel %vm550_vm10, %v552_v10, %v548_v46  ;;  %v467_v12 = vpop.xlane.xlu0 %466  ;;  %v827_v46 = vld [vmem:[%s1879_s5 + $0x18] sm:$0xff] }
 0x38e   :  { %1340 = vrcp.f32 %v467_v12  ;;  %v1719_v13 = vmul.f32 %v1681_v51, %v553_v11  ;;  %v536_v4 = vand.u32 2147483648, %v467_v12  ;;  %v534_v20 = vand.u32 2147483647, %v467_v12  ;;  %v826_v11 = vld [vmem:[%s1879_s5 + $0x10] sm:$0xff] }
 0x38f   :  { %vm530_vm12 = vweird.f32 %v467_v12 }
 0x390   :  { %612 = vst.msk [vmem:[#allocation8 + $0x20] sm:$0xff] %vm201_vm8, %v1719_v13  ;;  %v537_v23 = vor.u32 1.1754944e-38, %v536_v4  ;;  %vm535_vm14 = vcmp.eq.f32.partialorder %v534_v20, 8.507059e+37 }
 0x394   :  { %v1341_v14 = vpop.eup %1340 }
 0x395   :  { %v526_v15 = vmul.f32 %v1341_v14, %v467_v12  ;;  %v476_v16 = vpop.xlane.xlu1 %475  ;;  %vm531_vm11 = vweird.f32 %v1341_v14 }
 0x396   :  { %1342 = vrcp.f32 %v476_v16  ;;  %vm532_vm13 = vmor %vm530_vm12, %vm531_vm11  ;;  %v581_v28 = vand.u32 2147483648, %v476_v16  ;;  %v579_v30 = vand.u32 2147483647, %v476_v16  ;;  %vm575_vm1 = vweird.f32 %v476_v16 }
 0x397   :  { %v527_v17 = vsub.f32 1.0, %v526_v15 }
 0x398   :  { %v582_v32 = vor.u32 1.1754944e-38, %v581_v28  ;;  %vm580_vm3 = vcmp.eq.f32.partialorder %v579_v30, 8.507059e+37 }
 0x399   :  { %v528_v18 = vmul.f32 %v1341_v14, %v527_v17 }
 0x39b   :  { %v529_v21 = vadd.f32 %v1341_v14, %v528_v18 }
 0x39c   :  { %v1343_v22 = vpop.eup %1342 }
 0x39d   :  { %v533_v24 = vsel %vm532_vm13, %v1341_v14, %v529_v21  ;;  %v571_v51 = vmul.f32 %v1343_v22, %v476_v16  ;;  %vm576_vm15 = vweird.f32 %v1343_v22 }
 0x39e   :  { %v538_v25 = vsel %vm535_vm14, %v537_v23, %v533_v24  ;;  %vm577_vm2 = vmor %vm575_vm1, %vm576_vm15 }
 0x39f   :  { %v572_v26 = vsub.f32 1.0, %v571_v51  ;;  %v603_v27 = vmul.f32 %v1685_v58, %v538_v25  ;;  %v1305_v25 = vld [vmem:[%s1880_s6] ss:$0 sm:$0xff] }
 0x3a1   :  { %v573_v29 = vmul.f32 %v1343_v22, %v572_v26  ;;  %611 = vst.msk [vmem:[#allocation8 + $0x18] sm:$0xff] %vm201_vm8, %v603_v27  ;;  %1256 = vmatmul.msk.f32.vlgmr.msrb.gmra.mxu2 %vm201_vm8, %v603_v27 }
 0x3a2   :  { %936 = vmatpush.msrb.mxu2 %v827_v46 }
 0x3a3   :  { %v574_v31 = vadd.f32 %v1343_v22, %v573_v29 }
 0x3a5   :  { %v578_v33 = vsel %vm577_vm2, %v1343_v22, %v574_v31 }
 0x3a6   :  { %v583_v34 = vsel %vm580_vm3, %v582_v32, %v578_v33 }
 0x3a7   :  { %v606_v37 = vmul.f32 %v1689_v61, %v583_v34 }
 0x3a9   :  { %614 = vst.msk [vmem:[#allocation8 + $0x30] sm:$0xff] %vm201_vm8, %v606_v37 }
 0x3ab   :  { %v479_v58 = vpop.xlane.xlu0 %478 }
 0x3ac   :  { %1344 = vrcp.f32 %v479_v58  ;;  %v596_v35 = vand.u32 2147483648, %v479_v58  ;;  %v594_v45 = vand.u32 2147483647, %v479_v58  ;;  %vm590_vm5 = vweird.f32 %v479_v58 }
 0x3ad   :  { %v747_v38 = vpop.permute.xlu1 %746 }
 0x3ae   :  { %767 = vmatpush.msrb.mxu0 %v747_v38  ;;  %v597_v61 = vor.u32 1.1754944e-38, %v596_v35  ;;  %vm595_vm7 = vcmp.eq.f32.partialorder %v594_v45, 8.507059e+37 }
 0x3b2   :  { %v1345_v39 = vpop.eup %1344 }
 0x3b3   :  { %v586_v40 = vmul.f32 %v1345_v39, %v479_v58  ;;  %v473_v41 = vpop.xlane.xlu0 %472  ;;  %vm591_vm4 = vweird.f32 %v1345_v39  ;;  %v665_v8 = vpop.f32.mrf.mxu1 }
 0x3b4   :  { %1346 = vrcp.f32 %v473_v41  ;;  %vm592_vm6 = vmor %vm590_vm5, %vm591_vm4  ;;  %v566_v54 = vand.u32 2147483648, %v473_v41  ;;  %v564_v56 = vand.u32 2147483647, %v473_v41  ;;  %vm560_vm10 = vweird.f32 %v473_v41 }
 0x3b5   :  { %v587_v42 = vsub.f32 1.0, %v586_v40 }
 0x3b6   :  { %v567_v63 = vor.u32 1.1754944e-38, %v566_v54  ;;  %vm565_vm12 = vcmp.eq.f32.partialorder %v564_v56, 8.507059e+37 }
 0x3b7   :  { %v588_v44 = vmul.f32 %v1345_v39, %v587_v42 }
 0x3b9   :  { %v589_v47 = vadd.f32 %v1345_v39, %v588_v44  ;;  %v639_v7 = vpop.f32.mrf.mxu3 }
 0x3ba   :  { %v1347_v48 = vpop.eup %1346 }
 0x3bb   :  { %v593_v49 = vsel %vm592_vm6, %v1345_v39, %v589_v47  ;;  %v556_v50 = vmul.f32 %v1347_v48, %v473_v41  ;;  %vm561_vm9 = vweird.f32 %v1347_v48 }
 0x3bc   :  { %v598_v52 = vsel %vm595_vm7, %v597_v61, %v593_v49  ;;  %vm562_vm11 = vmor %vm560_vm10, %vm561_vm9  ;;  %v1029_v61 = vld [vmem:[%s1883_s9 + $0x18] sm:$0xff]  ;;  %v1027_v49 = vld [vmem:[%s1883_s9 + $0x8] sm:$0xff]  ;;  %vm1163_vm10 = vcmask 523264  }
 0x3bd   :  { %v557_v53 = vsub.f32 1.0, %v556_v50  ;;  %v607_v3 = vmul.f32 %v1698_v43, %v598_v52  ;;  %v1026_v52 = vld [vmem:[%s1883_s9] sm:$0xff] }
 0x3bf   :  { %v558_v55 = vmul.f32 %v1347_v48, %v557_v53  ;;  %615 = vst.msk [vmem:[#allocation8 + $0x38] sm:$0xff] %vm201_vm8, %v607_v3  ;;  %1260 = vmatmul.msk.f32.vlgmr.msra.gmra.mxu2 %vm201_vm8, %v607_v3 }
 0x3c1   :  { %v559_v57 = vadd.f32 %v1347_v48, %v558_v55 }
 0x3c3   :  { %v563_v2 = vsel %vm562_vm11, %v1347_v48, %v559_v57 }
 0x3c4   :  { %v568_v59 = vsel %vm565_vm12, %v567_v63, %v563_v2 }
 0x3c5   :  { %v605_v60 = vmul.f32 %v1708_v36, %v568_v59  ;;  %v825_v36 = vld [vmem:[%s1879_s5 + $0x8] sm:$0xff] }
 0x3c6   :  { %v1299_v62 = vpop.permute.xlu0 %1298  ;;  %878 = vmatpush.msra.mxu0 %v825_v36 }
 0x3c7   :  { %v1301_v5 = vunpack.i.h.bf16 %v1299_v62  ;;  %v1300_v43 = vunpack.i.l.bf16 %v1299_v62  ;;  %613 = vst.msk [vmem:[#allocation8 + $0x28] sm:$0xff] %vm201_vm8, %v605_v60  ;;  %1258 = vmatmul.msk.f32.vlgmr.msrb.gmra.mxu0 %vm201_vm8, %v605_v60 }
 0x3c9   :  { %741 = vmatpush.msrb.mxu3 %v1300_v43  ;;  %793 = vmatpush.msrb.mxu1 %v1301_v5 }
 0x3ca   :  { %1257 = vmatmul.msk.f32.vlgmr.msrb.gmra.mxu3 %vm201_vm8, %v1719_v13  ;;  %1259 = vmatmul.msk.f32.vlgmr.msrb.gmra.mxu1 %vm201_vm8, %v606_v37 }
 0x3cb   :  { %849 = vmatpush.msra.mxu3 %v824_v6  ;;  %907 = vmatpush.msra.mxu1 %v826_v11 }
 0x3cd   :  { %1052 = vmatpush.msrb.mxu3 %v1029_v61 }
 0x3d2   :  { %1261 = vmatmul.msk.f32.vlgmr.msra.gmra.mxu3 %vm201_vm8, %v639_v7 }
 0x3da   :  { %1262 = vmatmul.msk.f32.gmra.mxu3 %vm201_vm8, %v665_v8 }
 0x3ef   :  { %v691_v9 = vpop.f32.mrf.mxu1 }
 0x3f0   :  { %1263 = vmatmul.msk.f32.vlgmr.msra.gmra.mxu0 %vm201_vm8, %v691_v9 }
 0x424   :  { %v717_v10 = vpop.f32.mrf.mxu2 }
 0x425   :  { %1264 = vmatmul.msk.f32.gmra.mxu0 %vm201_vm8, %v717_v10 }
 0x442   :  { %v821_v14 = vpop.f32.mrf.mxu2 }
 0x444   :  { %v769_v15 = vpop.f32.mrf.mxu0 }
 0x447   :  { %v795_v12 = vpop.f32.mrf.mxu1 }
 0x448   :  { %1267 = vmatmul.msk.f32.vlgmr.msrb.gmra.mxu2 %vm201_vm8, %v795_v12 }
 0x44d   :  { %v743_v13 = vpop.f32.mrf.mxu3 }
 0x44e   :  { %1265 = vmatmul.msk.f32.vlgmr.msra.gmra.mxu1 %vm201_vm8, %v743_v13  ;;  %v1306_v13 = vld [vmem:[%s1881_s7] ss:$0 sm:$0xff]  ;;  %s1201_s7 = sshll.u32 %s1471_s4, 4  ;;  %s1202_s7 = int_to_ptr.vmem [resolvable:$true] %s1201_s7 }
 0x450   :  { %1268 = vmatmul.msk.f32.gmra.mxu2 %vm201_vm8, %v821_v14 }
 0x455   :  { %v851_v16 = vpop.f32.mrf.mxu3 }
 0x456   :  { %1266 = vmatmul.msk.f32.gmra.mxu1 %vm201_vm8, %v769_v15  ;;  %v944_v18 = vsel %vm82_vm0, %v851_v16, 0.0  ;;  %v1307_v16 = vld [vmem:[%s1882_s8] ss:$0 sm:$0xff] }
 0x45d   :  { %v854_v27 = vpop.f32.mrf.mxu3 }
 0x45e   :  { %v951_v31 = vsel %vm82_vm0, %v854_v27, 0.0 }
 0x46d   :  { %v880_v17 = vpop.f32.mrf.mxu0 }
 0x46e   :  { %v945_v4 = vsel %vm82_vm0, %v880_v17, 0.0 }
 0x46f   :  { %v946_v20 = vadd.f32 %v945_v4, %v944_v18 }
 0x4a2   :  { %v883_v24 = vpop.f32.mrf.mxu0 }
 0x4a3   :  { %v952_v29 = vsel %vm82_vm0, %v883_v24, 0.0 }
 0x4a4   :  { %v953_v32 = vadd.f32 %v952_v29, %v951_v31 }
 0x4cb   :  { %v909_v21 = vpop.f32.mrf.mxu1  ;;  %v938_v22 = vpop.f32.mrf.mxu2 }
 0x4cc   :  { %v947_v23 = vsel %vm82_vm0, %v909_v21, 0.0  ;;  %v949_v26 = vsel %vm82_vm0, %v938_v22, 0.0 }
 0x4cd   :  { %v948_v51 = vadd.f32 %v947_v23, %v946_v20 }
 0x4cf   :  { %v950_v28 = vadd.f32 %v949_v26, %v948_v51  ;;  %v1308_v26 = vld [vmem:[%s1884_s10] ss:$0 sm:$0xff] }
 0x4d1   :  { %v962_v30 = vadd.f32 %v1305_v25, %v950_v28 }
 0x4d3   :  { %v1767_v33 = vadd.f32 %v962_v30, %v1558_v1  ;;  %v912_v34 = vpop.f32.mrf.mxu1  ;;  %v941_v37 = vpop.f32.mrf.mxu2 }
 0x4d4   :  { %v954_v58 = vsel %vm82_vm0, %v912_v34, 0.0  ;;  %v956_v41 = vsel %vm82_vm0, %v941_v37, 0.0  ;;  %v1158_v34 = vld [vmem:[%s1885_s11 + $0x38] sm:$0xff] }
 0x4d5   :  { %v955_v38 = vadd.f32 %v954_v58, %v953_v32  ;;  %v968_v39 = vsel %vm82_vm0, %v1767_v33, 0.0  ;;  %v976_v40 = vmul.f32 %v1767_v33, %v1767_v33  ;;  %1178 = vmatpush.msrb.mxu0 %v1158_v34 }
 0x4d6   :  { %969 = vadd.xlane.f32.xlu2 %v968_v39  ;;  %v1157_v39 = vld [vmem:[%s1885_s11 + $0x30] sm:$0xff] }
 0x4d7   :  { %v957_v42 = vadd.f32 %v956_v41, %v955_v38  ;;  %v978_v35 = vsel %vm82_vm0, %v976_v40, 0.0  ;;  %1179 = vmatpush.msrb.mxu0 %v1157_v39 }
 0x4d8   :  { %979 = vadd.xlane.f32.xlu0 %v978_v35  ;;  %v1156_v35 = vld [vmem:[%s1885_s11 + $0x28] sm:$0xff] }
 0x4d9   :  { %v963_v1 = vadd.f32 %v1305_v25, %v957_v42  ;;  %1180 = vmatpush.msrb.mxu0 %v1156_v35 }
 0x4db   :  { %v1777_v44 = vadd.f32 %v963_v1, %v1556_v0  ;;  %v1028_v0 = vld [vmem:[%s1883_s9 + $0x10] sm:$0xff]  ;;  %s1216_s9 = sshll.u32 %s1888_s14, 4  ;;  %s1217_s9 = int_to_ptr.hbm [resolvable:$true] %s1216_s9 }
 0x4dc   :  { %1053 = vmatpush.msrb.mxu3 %v1028_v0 }
 0x4dd   :  { %v971_v45 = vsel %vm82_vm0, %v1777_v44, 0.0  ;;  %v977_v47 = vmul.f32 %v1777_v44, %v1777_v44 }
 0x4de   :  { %972 = vadd.xlane.f32.xlu1 %v971_v45  ;;  %1054 = vmatpush.msrb.mxu3 %v1027_v49 }
 0x4df   :  { %v981_v48 = vsel %vm82_vm0, %v977_v47, 0.0 }
 0x4e0   :  { %982 = vadd.xlane.f32.xlu2 %v981_v48  ;;  %1055 = vmatpush.msrb.mxu3 %v1026_v52  ;;  %v1155_v48 = vld [vmem:[%s1885_s11 + $0x20] sm:$0xff] }
 0x4e1   :  { %1181 = vmatpush.msrb.mxu0 %v1155_v48 }
 0x549   :  { %v970_v50 = vpop.xlane.xlu2 %969 }
 0x54a   :  { %v974_v53 = vmul.f32 %v970_v50, %v1579_v19  ;;  %v1154_v50 = vld [vmem:[%s1885_s11 + $0x18] sm:$0xff] }
 0x54b   :  { %v980_v3 = vpop.xlane.xlu0 %979  ;;  %1182 = vmatpush.msrb.mxu0 %v1154_v50 }
 0x54c   :  { %v986_v54 = vmul.f32 %v974_v53, %v974_v53  ;;  %v984_v55 = vmul.f32 %v980_v3, %v1579_v19  ;;  %v990_v12 = vsub.f32 %v1767_v33, %v974_v53 }
 0x54e   :  { %v988_v56 = vsub.f32 %v984_v55, %v986_v54  ;;  %v1153_v54 = vld [vmem:[%s1885_s11 + $0x10] sm:$0xff] }
 0x54f   :  { %1183 = vmatpush.msrb.mxu0 %v1153_v54 }
 0x550   :  { %v992_v57 = vadd.f32 1e-06, %v988_v56 }
 0x551   :  { %v973_v63 = vpop.xlane.xlu1 %972 }
 0x552   :  { %1348 = vrsqrt.f32 %v992_v57  ;;  %v975_v2 = vmul.f32 %v973_v63, %v1579_v19  ;;  %vm1000_vm13 = vweird.f32 %v992_v57 }
 0x553   :  { %v983_v59 = vpop.xlane.xlu2 %982 }
 0x554   :  { %v987_v60 = vmul.f32 %v975_v2, %v975_v2  ;;  %v985_v62 = vmul.f32 %v983_v59, %v1579_v19  ;;  %v991_v22 = vsub.f32 %v1777_v44, %v975_v2  ;;  %v1152_v2 = vld [vmem:[%s1885_s11 + $0x8] sm:$0xff] }
 0x555   :  { %1184 = vmatpush.msrb.mxu0 %v1152_v2 }
 0x556   :  { %v989_v5 = vsub.f32 %v985_v62, %v987_v60 }
 0x558   :  { %v1349_v43 = vpop.eup %1348  ;;  %v993_v6 = vadd.f32 1e-06, %v989_v5  ;;  %v1151_v5 = vld [vmem:[%s1885_s11] sm:$0xff]  ;;  %s1470_s11 = smov [#allocation8]  }
 0x559   :  { %v995_v36 = vmul.f32 %v1349_v43, %v992_v57  ;;  %vm1001_vm8 = vweird.f32 %v1349_v43  ;;  %1185 = vmatpush.msrb.mxu0 %v1151_v5  ;;  %s1214_s17 = sshll.u32 %s1470_s11, 4  ;;  %s1215_s17 = int_to_ptr.vmem [resolvable:$true] %s1214_s17 }
 0x55a   :  { %1350 = vrsqrt.f32 %v993_v6  ;;  %vm1002_vm14 = vmor %vm1000_vm13, %vm1001_vm8  ;;  %vm1010_vm1 = vweird.f32 %v993_v6  ;;  %1222 = dma.vmem_to_hbm [thread:$0]  %s1215_s17, 1024, %s1217_s9, [#allocation9], %s1461_s21, %s1461_s21, %s1462_s22  }
 0x55b   :  { %v996_v7 = vmul.f32 %v1349_v43, %v995_v36 }
 0x55d   :  { %v997_v8 = vmul.f32 0.5, %v996_v7 }
 0x55f   :  { %v998_v9 = vsub.f32 1.5, %v997_v8 }
 0x560   :  { %v1351_v10 = vpop.eup %1350 }
 0x561   :  { %v999_v46 = vmul.f32 %v1349_v43, %v998_v9  ;;  %v1005_v11 = vmul.f32 %v1351_v10, %v993_v6  ;;  %vm1011_vm15 = vweird.f32 %v1351_v10 }
 0x562   :  { %vm1012_vm2 = vmor %vm1010_vm1, %vm1011_vm15 }
 0x563   :  { %v1003_v19 = vsel %vm1002_vm14, %v1349_v43, %v999_v46  ;;  %v1006_v14 = vmul.f32 %v1351_v10, %v1005_v11 }
 0x564   :  { %v1014_v15 = vmul.f32 %v1003_v19, %v990_v12 }
 0x565   :  { %v1007_v17 = vmul.f32 0.5, %v1006_v14 }
 0x566   :  { %v1019_v4 = vmul.f32 %v1306_v13, %v1014_v15 }
 0x567   :  { %v1008_v18 = vsub.f32 1.5, %v1007_v17 }
 0x568   :  { %v1024_v20 = vadd.f32 %v1307_v16, %v1019_v4 }
 0x569   :  { %v1009_v21 = vmul.f32 %v1351_v10, %v1008_v18 }
 0x56a   :  { %1269 = vmatmul.msk.f32.vlgmr.msrb.gmra.mxu3 %vm82_vm0, %v1024_v20 }
 0x56b   :  { %v1013_v23 = vsel %vm1012_vm2, %v1351_v10, %v1009_v21 }
 0x56c   :  { %v1015_v24 = vmul.f32 %v1013_v23, %v991_v22 }
 0x56e   :  { %v1020_v51 = vmul.f32 %v1306_v13, %v1015_v24 }
 0x570   :  { %v1025_v25 = vadd.f32 %v1307_v16, %v1020_v51 }
 0x572   :  { %1270 = vmatmul.msk.f32.gmra.mxu3 %vm82_vm0, %v1025_v25 }
 0x5ed   :  { %v1057_v27 = vpop.f32.mrf.mxu3 }
 0x5ee   :  { %v1813_v28 = vadd.f32 %v1308_v26, %v1057_v27 }
 0x5f0   :  { %v1816_v29 = vmul.f32 0.70710677, %v1813_v28 }
 0x5f2   :  { %v1067_v30 = vmul.f32 %v1816_v29, %v1816_v29 }
 0x5f4   :  { %v1068_v31 = vmin.f32 %v1067_v30, 16.0 }
 0x5f5   :  { %v1060_v32 = vpop.f32.mrf.mxu3 }
 0x5f6   :  { %v1069_v37 = vmul.f32 2.1237322e-06, %v1068_v31  ;;  %v1080_v58 = vmul.f32 3.8918573e-05, %v1068_v31  ;;  %v1823_v38 = vadd.f32 %v1308_v26, %v1060_v32 }
 0x5f8   :  { %v1070_v40 = vadd.f32 0.00028619796, %v1069_v37  ;;  %v1081_v41 = vadd.f32 0.001143296, %v1080_v58  ;;  %v1829_v42 = vmul.f32 0.70710677, %v1823_v38 }
 0x5fa   :  { %v1071_v1 = vmul.f32 %v1070_v40, %v1068_v31  ;;  %v1082_v45 = vmul.f32 %v1081_v41, %v1068_v31  ;;  %v1107_v47 = vmul.f32 %v1829_v42, %v1829_v42 }
 0x5fc   :  { %v1083_v61 = vadd.f32 0.014752088, %v1082_v45  ;;  %v1072_v0 = vadd.f32 0.0036580483, %v1071_v1  ;;  %v1108_v49 = vmin.f32 %v1107_v47, 16.0 }
 0x5fe   :  { %v1084_v52 = vmul.f32 %v1083_v61, %v1068_v31  ;;  %v1109_v53 = vmul.f32 2.1237322e-06, %v1108_v49  ;;  %v1120_v3 = vmul.f32 3.8918573e-05, %v1108_v49  ;;  %v1073_v56 = vmul.f32 %v1072_v0, %v1068_v31 }
 0x5ff   :  { %v1063_v61 = vmul.f32 0.5, %v1813_v28  ;;  %v1309_v28 = vld [vmem:[%s1886_s12] ss:$0 sm:$0xff] }
 0x600   :  { %v1085_v55 = vadd.f32 0.112945676, %v1084_v52  ;;  %v1110_v57 = vadd.f32 0.00028619796, %v1109_v53  ;;  %v1121_v63 = vadd.f32 0.001143296, %v1120_v3 }
 0x601   :  { %v1074_v6 = vadd.f32 0.05243302, %v1073_v56  ;;  %v1064_v56 = vmul.f32 0.5, %v1823_v38 }
 0x602   :  { %v1086_v59 = vmul.f32 %v1085_v55, %v1068_v31  ;;  %v1111_v60 = vmul.f32 %v1110_v57, %v1108_v49  ;;  %v1122_v62 = vmul.f32 %v1121_v63, %v1108_v49 }
 0x603   :  { %v1075_v46 = vmul.f32 %v1074_v6, %v1068_v31 }
 0x604   :  { %v1087_v43 = vadd.f32 0.4994258, %v1086_v59  ;;  %v1123_v36 = vadd.f32 0.014752088, %v1122_v62  ;;  %v1112_v8 = vadd.f32 0.0036580483, %v1111_v60 }
 0x605   :  { %v1076_v19 = vadd.f32 0.18741608, %v1075_v46 }
 0x606   :  { %v1088_v7 = vmul.f32 %v1087_v43, %v1068_v31  ;;  %v1124_v9 = vmul.f32 %v1123_v36, %v1108_v49  ;;  %v1113_v12 = vmul.f32 %v1112_v8, %v1108_v49 }
 0x607   :  { %v1077_v4 = vmul.f32 %v1076_v19, %v1068_v31 }
 0x608   :  { %v1089_v10 = vadd.f32 1.0, %v1088_v7  ;;  %v1125_v11 = vadd.f32 0.112945676, %v1124_v9  ;;  %v1114_v15 = vadd.f32 0.05243302, %v1113_v12 }
 0x609   :  { %v1078_v24 = vadd.f32 1.1283791, %v1077_v4 }
 0x60a   :  { %1352 = vrcp.f32 %v1089_v10  ;;  %v1126_v13 = vmul.f32 %v1125_v11, %v1108_v49  ;;  %v1115_v21 = vmul.f32 %v1114_v15, %v1108_v49  ;;  %v1101_v23 = vand.u32 2147483648, %v1089_v10 }
 0x60b   :  { %v1099_v25 = vand.u32 2147483647, %v1089_v10  ;;  %vm1095_vm4 = vweird.f32 %v1089_v10  ;;  %v1079_v34 = vmul.f32 %v1078_v24, %v1816_v29 }
 0x60c   :  { %v1127_v14 = vadd.f32 0.4994258, %v1126_v13  ;;  %v1116_v26 = vadd.f32 0.18741608, %v1115_v21  ;;  %v1102_v30 = vor.u32 1.1754944e-38, %v1101_v23 }
 0x60d   :  { %vm1100_vm6 = vcmp.eq.f32.partialorder %v1099_v25, 8.507059e+37 }
 0x60e   :  { %v1128_v16 = vmul.f32 %v1127_v14, %v1108_v49  ;;  %v1117_v58 = vmul.f32 %v1116_v26, %v1108_v49 }
 0x610   :  { %v1353_v17 = vpop.eup %1352  ;;  %v1129_v20 = vadd.f32 1.0, %v1128_v16  ;;  %v1118_v45 = vadd.f32 1.1283791, %v1117_v58 }
 0x611   :  { %v1091_v18 = vmul.f32 %v1353_v17, %v1089_v10  ;;  %vm1096_vm3 = vweird.f32 %v1353_v17 }
 0x612   :  { %1354 = vrcp.f32 %v1129_v20  ;;  %vm1097_vm5 = vmor %vm1095_vm4, %vm1096_vm3  ;;  %v1141_v1 = vand.u32 2147483648, %v1129_v20  ;;  %v1139_v48 = vand.u32 2147483647, %v1129_v20  ;;  %vm1135_vm9 = vweird.f32 %v1129_v20 }
 0x613   :  { %v1092_v22 = vsub.f32 1.0, %v1091_v18  ;;  %v1119_v49 = vmul.f32 %v1118_v45, %v1829_v42 }
 0x614   :  { %v1142_v52 = vor.u32 1.1754944e-38, %v1141_v1  ;;  %vm1140_vm12 = vcmp.eq.f32.partialorder %v1139_v48, 8.507059e+37 }
 0x615   :  { %v1093_v51 = vmul.f32 %v1353_v17, %v1092_v22 }
 0x617   :  { %v1094_v27 = vadd.f32 %v1353_v17, %v1093_v51 }
 0x618   :  { %v1355_v32 = vpop.eup %1354 }
 0x619   :  { %v1098_v37 = vsel %vm1097_vm5, %v1353_v17, %v1094_v27  ;;  %v1131_v39 = vmul.f32 %v1355_v32, %v1129_v20  ;;  %vm1136_vm7 = vweird.f32 %v1355_v32 }
 0x61a   :  { %v1103_v31 = vsel %vm1100_vm6, %v1102_v30, %v1098_v37  ;;  %vm1137_vm11 = vmor %vm1135_vm9, %vm1136_vm7 }
 0x61b   :  { %v1104_v40 = vmul.f32 %v1103_v31, %v1079_v34  ;;  %v1132_v41 = vsub.f32 1.0, %v1131_v39 }
 0x61d   :  { %v1271_v35 = vclamps-f32 %v1104_v40, 1.0  ;;  %v1133_v47 = vmul.f32 %v1355_v32, %v1132_v41 }
 0x61f   :  { %v1147_v0 = vadd.f32 1.0, %v1271_v35  ;;  %v1134_v50 = vadd.f32 %v1355_v32, %v1133_v47 }
 0x621   :  { %v1149_v29 = vmul.f32 %v1147_v0, %v1063_v61  ;;  %v1138_v53 = vsel %vm1137_vm11, %v1355_v32, %v1134_v50 }
 0x622   :  { %v1143_v3 = vsel %vm1140_vm12, %v1142_v52, %v1138_v53 }
 0x623   :  { %1273 = vmatmul.msk.f32.vlgmr.msrb.gmra.mxu0 %vm1163_vm10, %v1149_v29  ;;  %v1144_v54 = vmul.f32 %v1143_v3, %v1119_v49 }
 0x625   :  { %v1272_v55 = vclamps-f32 %v1144_v54, 1.0 }
 0x627   :  { %v1148_v57 = vadd.f32 1.0, %v1272_v55 }
 0x629   :  { %v1150_v63 = vmul.f32 %v1148_v57, %v1064_v56 }
 0x62b   :  { %1274 = vmatmul.msk.f32.gmra.mxu0 %vm1163_vm10, %v1150_v63 }
 0x6a0   :  { %v1187_v38 = vpop.f32.mrf.mxu0 }
 0x6a1   :  { %v1188_v42 = vadd.f32 %v1309_v28, %v1187_v38 }
 0x6a3   :  { %v1193_v2 = vadd.f32 %v1188_v42, %v1767_v33 }
 0x6a5   :  { %1195 = vst.msk [vmem:[#allocation7] sm:$0xff] %vm82_vm0, %v1193_v2 }
 0x6a8   :  { %v1190_v59 = vpop.f32.mrf.mxu0 }
 0x6a9   :  { %v1191_v60 = vadd.f32 %v1309_v28, %v1190_v59 }
 0x6ab   :  { %v1194_v62 = vadd.f32 %v1191_v60, %v1777_v44 }
 0x6ad   :  { %1196 = vst.msk [vmem:[#allocation7 + $0x8] sm:$0xff] %vm82_vm0, %v1194_v62 }
 0x6ae   :  { %1209 = dma.vmem_to_hbm [thread:$0]  %s1202_s7, 256, %s1204_s23, [#allocation4], %s1461_s21, %s1461_s21, %s1462_s22  }
 0x6af   :  { %1456 = dma.done.wait [#allocation4], 256  }
 0x6b0   :  { %1457 = vsyncadd [#allocation4], 4294967040 }
 0x6b1   :  { %1458 = dma.done.wait [#allocation9], 1024  }
 0x6b2   :  { %1459 = vsyncadd [#allocation9], 4294966272 }
 0x6b3   :  { %1231 = vsyncpa [#allocation3], 1 }
 0x6b4   :  { %1232 = vsyncpa [#allocation6], 1 }
 0x6b5   :  { %1233 = vsyncpa [#allocation4], 1 }
 0x6b6   :  { %1234 = vsyncpa [#allocation9], 1 }

</bundles_post_ra>
